<compile_context>
chip_gen: v7x
topology: tpu7x:2x2x1
jax: 0.10.0
libtpu: 0.0.40
codegen_flags: <defaults>
</compile_context>

<pallas_src>
import functools

import jax
import jax.numpy as jnp
from jax.experimental import pallas as pl
from jax.experimental.pallas import tpu as pltpu

EPS = 1e-5
NEG_SLOPE = 0.01  # nn.LeakyReLU default


def _leaky(x):
    return jnp.where(x > 0, x, NEG_SLOPE * x)


def _bn_train(x, gamma, beta, mask=None, count=None):
    """Training-mode BatchNorm1d (biased variance) over rows of (R, F).

    If `mask` is given, rows with mask==0 are excluded from the statistics
    (`count` = number of valid rows). Normalization is applied to every row;
    invalid rows are discarded downstream."""
    if mask is None:
        mean = jnp.mean(x, axis=0, keepdims=True)
        var = jnp.mean((x - mean) ** 2, axis=0, keepdims=True)
    else:
        inv_cnt = 1.0 / count
        mean = jnp.sum(x * mask, axis=0, keepdims=True) * inv_cnt
        d = (x - mean) * mask
        var = jnp.sum(d * d, axis=0, keepdims=True) * inv_cnt
    scale = gamma * jax.lax.rsqrt(var + EPS)
    shift = beta - mean * scale
    return x * scale + shift  # single fused FMA per element


def encoder_block_kernel(xds_ref, wp_ref, w1_ref, w2_ref, p_ref, out_ref, *, N, T, K):
    # xds_ref: (N*T, pool*C_in)  stacked strided-conv patches (all samples)
    # wp_ref : (pool*C_in, F)    expand conv weight, matmul form
    # w1/w2  : (K*F, F)          BasicBlock conv weights, im2col matmul form
    # p_ref  : (9, F)            packed [bp, b1, b2, g0, be0, g1, be1, g2, be2]
    # out_ref: (N*T - 2*(K-1), F)
    F = wp_ref.shape[1]
    NT = N * T
    L1 = T - (K - 1)           # per-sample length after conv1
    L2 = T - 2 * (K - 1)       # per-sample length after conv2
    M1 = NT - (K - 1)          # stacked rows after conv1
    M2 = NT - 2 * (K - 1)      # stacked rows after conv2

    bp, b1, b2 = p_ref[0:1, :], p_ref[1:2, :], p_ref[2:3, :]
    g0, be0 = p_ref[3:4, :], p_ref[4:5, :]
    g1, be1 = p_ref[5:6, :], p_ref[6:7, :]
    g2, be2 = p_ref[7:8, :], p_ref[8:9, :]

    # Validity masks: stacked row r is sample r // T at in-sample position
    # r % T; positions >= L (windows crossing a sample boundary) are excluded
    # from BN statistics.
    r1 = jax.lax.broadcasted_iota(jnp.int32, (M1, F), 0)
    mask1 = ((r1 % T) < L1).astype(jnp.float32)
    r2 = jax.lax.broadcasted_iota(jnp.int32, (M2, F), 0)
    mask2 = ((r2 % T) < L2).astype(jnp.float32)

    # ---- expand: Conv1d(C->F, k=pool, stride=pool) as ONE stacked matmul + BN
    h0 = jnp.dot(xds_ref[...], wp_ref[...],
                 preferred_element_type=jnp.float32) + bp          # (NT, F)
    h0 = _bn_train(h0, g0, be0)

    # ---- conv1 (valid): stacked im2col -> ONE (M1, K*F) x (K*F, F) matmul ----
    p1 = jnp.concatenate([h0[k:k + M1, :] for k in range(K)], axis=-1)
    o1 = jnp.dot(p1, w1_ref[...], preferred_element_type=jnp.float32) + b1
    o1 = _leaky(_bn_train(o1, g1, be1, mask=mask1, count=float(N * L1)))

    # ---- conv2 (valid) + BN ----
    p2 = jnp.concatenate([o1[k:k + M2, :] for k in range(K)], axis=-1)
    o2 = jnp.dot(p2, w2_ref[...], preferred_element_type=jnp.float32) + b2
    o2 = _bn_train(o2, g2, be2, mask=mask2, count=float(N * L2))

    # ---- center-crop residual add + LeakyReLU, single bulk store ----
    start = (T - L2) // 2
    res = h0[start:start + M2, :]
    out_ref[...] = _leaky(o2 + res)


def encoder_block_forward(x_ncl, params, pool, kernel_size):
    """x_ncl: (N, C_in, L) float32, PyTorch NCL layout. Returns (N, F, L2)."""
    N, C, L = x_ncl.shape
    F = params["wp"].shape[0]
    K = kernel_size
    T = L // pool
    L2 = T - 2 * (K - 1)
    M2 = N * T - 2 * (K - 1)

    # NCL -> NLC -> stacked strided-conv patches:
    #   x_ds[n*T + t, p*C + c] = x[n, c, t*pool + p]
    x_nlc = jnp.transpose(x_ncl, (0, 2, 1))
    x_ds = x_nlc[:, :T * pool, :].reshape(N * T, pool * C)

    # Weights in matmul form.
    #   wp_mat[p*C + c, f] = wp[f, c, p];  w_mat[k*F + c, f] = w[f, c, k]
    wp = jnp.transpose(params["wp"], (2, 1, 0)).reshape(pool * C, F)
    w1 = jnp.transpose(params["w1"], (2, 1, 0)).reshape(K * F, F)
    w2 = jnp.transpose(params["w2"], (2, 1, 0)).reshape(K * F, F)

    # Pack the 9 per-channel parameter vectors into one buffer (one DMA).
    packed = jnp.stack([params["bp"], params["b1"], params["b2"],
                        params["g0"], params["be0"],
                        params["g1"], params["be1"],
                        params["g2"], params["be2"]], axis=0)

    # Single invocation, everything resident in VMEM (tiny working set).
    # TODO(synk): for large N/L, add an L-tiled grid with a separate BN-stats
    # pass (batch-wide statistics) and a "parallel" batch axis for v7x's two
    # TensorCores; at this size the extra grid steps only add overhead.
    vmem = pl.BlockSpec(memory_space=pltpu.MemorySpace.VMEM)
    out_flat = pl.pallas_call(
        functools.partial(encoder_block_kernel, N=N, T=T, K=K),
        out_shape=jax.ShapeDtypeStruct((M2, F), jnp.float32),
        in_specs=[vmem] * 5,
        out_specs=vmem,
    )(x_ds, wp, w1, w2, packed)

    # Keep the L2 valid rows of each sample, drop the cross-boundary rows,
    # and go back to NCL layout (cheap XLA gather outside the kernel).
    row_idx = jnp.arange(N)[:, None] * T + jnp.arange(L2)[None, :]    # (N, L2)
    out_nlf = out_flat[row_idx]                                       # (N, L2, F)
    return jnp.transpose(out_nlf, (0, 2, 1))


# ----------------------- pure-JAX reference (NCL) ----------------------------
def reference_forward(x, p, pool, K):
    def conv1d(x, w, b, stride=1):
        y = jax.lax.conv_general_dilated(
            x, w, window_strides=(stride,), padding="VALID",
            dimension_numbers=("NCH", "OIH", "NCH"))
        return y + b[None, :, None]

    def bn(x, g, b):
        m = jnp.mean(x, axis=(0, 2), keepdims=True)
        v = jnp.mean((x - m) ** 2, axis=(0, 2), keepdims=True)
        return (x - m) / jnp.sqrt(v + EPS) * g[None, :, None] + b[None, :, None]

    h = bn(conv1d(x, p["wp"], p["bp"], stride=pool), p["g0"], p["be0"])
    o = _leaky(bn(conv1d(h, p["w1"], p["b1"]), p["g1"], p["be1"]))
    o = bn(conv1d(o, p["w2"], p["b2"]), p["g2"], p["be2"])
    L2 = o.shape[-1]
    start = (h.shape[-1] - L2) // 2
    return _leaky(o + jax.lax.dynamic_slice_in_dim(h, start, L2, axis=2))


if __name__ == "__main__":
    # Module hyper-params: in_channels=4, features=16, kernel_size=3, pool=2
    N, C_IN, L = 2, 4, 64
    F, K, POOL = 16, 3, 2

    key = jax.random.PRNGKey(0)
    ks = jax.random.split(key, 12)
    params = {
        "wp": 0.2 * jax.random.normal(ks[0], (F, C_IN, POOL), jnp.float32),
        "bp": 0.1 * jax.random.normal(ks[1], (F,), jnp.float32),
        "w1": 0.2 * jax.random.normal(ks[2], (F, F, K), jnp.float32),
        "b1": 0.1 * jax.random.normal(ks[3], (F,), jnp.float32),
        "w2": 0.2 * jax.random.normal(ks[4], (F, F, K), jnp.float32),
        "b2": 0.1 * jax.random.normal(ks[5], (F,), jnp.float32),
        "g0": 1.0 + 0.1 * jax.random.normal(ks[6], (F,), jnp.float32),
        "be0": 0.1 * jax.random.normal(ks[7], (F,), jnp.float32),
        "g1": 1.0 + 0.1 * jax.random.normal(ks[8], (F,), jnp.float32),
        "be1": 0.1 * jax.random.normal(ks[9], (F,), jnp.float32),
        "g2": 1.0 + 0.1 * jax.random.normal(ks[10], (F,), jnp.float32),
        "be2": 0.1 * jax.random.normal(ks[11], (F,), jnp.float32),
    }
    x = jax.random.normal(jax.random.PRNGKey(1), (N, C_IN, L), jnp.float32)

    out = jax.block_until_ready(encoder_block_forward(x, params, POOL, K))
    ref = jax.block_until_ready(reference_forward(x, params, POOL, K))

    assert out.shape == ref.shape == (N, F, (L // POOL) - 2 * (K - 1)), out.shape
    assert jnp.allclose(out, ref, rtol=1e-4, atol=1e-4), float(jnp.max(jnp.abs(out - ref)))
    print("KERNEL_OK")
</pallas_src>

<mosaic_0001>
module attributes {stable_mosaic.version = 11 : i64} {
  func.func @encoder_block_kernel(%arg0: memref<64x8xf32, #tpu.memory_space<vmem>>, %arg1: memref<8x16xf32, #tpu.memory_space<vmem>>, %arg2: memref<48x16xf32, #tpu.memory_space<vmem>>, %arg3: memref<48x16xf32, #tpu.memory_space<vmem>>, %arg4: memref<9x16xf32, #tpu.memory_space<vmem>>, %arg5: memref<60x16xf32, #tpu.memory_space<vmem>>) attributes {dimension_semantics = [], scalar_prefetch = 0 : i64, scratch_operands = 0 : i64, tpu.core_type = #tpu.core_type<tc>} {
    %c0 = arith.constant 0 : index
    %c0_0 = arith.constant 0 : index
    %0 = vector.load %arg4[%c0, %c0_0] : memref<9x16xf32, #tpu.memory_space<vmem>>, vector<1x16xf32>
    %c1 = arith.constant 1 : index
    %c0_1 = arith.constant 0 : index
    %1 = vector.load %arg4[%c1, %c0_1] : memref<9x16xf32, #tpu.memory_space<vmem>>, vector<1x16xf32>
    %c2 = arith.constant 2 : index
    %c0_2 = arith.constant 0 : index
    %2 = vector.load %arg4[%c2, %c0_2] : memref<9x16xf32, #tpu.memory_space<vmem>>, vector<1x16xf32>
    %c3 = arith.constant 3 : index
    %c0_3 = arith.constant 0 : index
    %3 = vector.load %arg4[%c3, %c0_3] : memref<9x16xf32, #tpu.memory_space<vmem>>, vector<1x16xf32>
    %c4 = arith.constant 4 : index
    %c0_4 = arith.constant 0 : index
    %4 = vector.load %arg4[%c4, %c0_4] : memref<9x16xf32, #tpu.memory_space<vmem>>, vector<1x16xf32>
    %c5 = arith.constant 5 : index
    %c0_5 = arith.constant 0 : index
    %5 = vector.load %arg4[%c5, %c0_5] : memref<9x16xf32, #tpu.memory_space<vmem>>, vector<1x16xf32>
    %c6 = arith.constant 6 : index
    %c0_6 = arith.constant 0 : index
    %6 = vector.load %arg4[%c6, %c0_6] : memref<9x16xf32, #tpu.memory_space<vmem>>, vector<1x16xf32>
    %c7 = arith.constant 7 : index
    %c0_7 = arith.constant 0 : index
    %7 = vector.load %arg4[%c7, %c0_7] : memref<9x16xf32, #tpu.memory_space<vmem>>, vector<1x16xf32>
    %c8 = arith.constant 8 : index
    %c0_8 = arith.constant 0 : index
    %8 = vector.load %arg4[%c8, %c0_8] : memref<9x16xf32, #tpu.memory_space<vmem>>, vector<1x16xf32>
    %9 = tpu.iota {dimensions = array<i32: 0>} : vector<62x16xi32>
    %c32_i32 = arith.constant 32 : i32
    %c0_i32 = arith.constant 0 : i32
    %10 = arith.cmpi eq, %c32_i32, %c0_i32 : i32
    %c1_i32 = arith.constant 1 : i32
    %11 = arith.select %10, %c1_i32, %c32_i32 : i32
    %12 = vector.broadcast %11 : i32 to vector<62x16xi32>
    %13 = arith.remsi %9, %12 : vector<62x16xi32>
    %c0_i32_9 = arith.constant 0 : i32
    %14 = vector.broadcast %c0_i32_9 : i32 to vector<62x16xi32>
    %15 = arith.cmpi ne, %13, %14 : vector<62x16xi32>
    %c0_i32_10 = arith.constant 0 : i32
    %16 = vector.broadcast %c0_i32_10 : i32 to vector<62x16xi32>
    %17 = arith.cmpi slt, %13, %16 : vector<62x16xi32>
    %c0_i32_11 = arith.constant 0 : i32
    %18 = arith.cmpi slt, %11, %c0_i32_11 : i32
    %19 = vector.broadcast %18 : i1 to vector<62x16xi1>
    %20 = vector.broadcast %19 : vector<62x16xi1> to vector<62x16xi1>
    %21 = arith.xori %17, %20 : vector<62x16xi1>
    %22 = arith.andi %21, %15 : vector<62x16xi1>
    %23 = vector.broadcast %11 : i32 to vector<62x16xi32>
    %24 = arith.addi %13, %23 : vector<62x16xi32>
    %25 = arith.select %22, %24, %13 : vector<62x16xi1>, vector<62x16xi32>
    %c30_i32 = arith.constant 30 : i32
    %26 = vector.broadcast %c30_i32 : i32 to vector<62x16xi32>
    %27 = arith.cmpi slt, %25, %26 : vector<62x16xi32>
    %28 = arith.extui %27 : vector<62x16xi1> to vector<62x16xi32>
    %29 = arith.sitofp %28 : vector<62x16xi32> to vector<62x16xf32>
    %30 = tpu.iota {dimensions = array<i32: 0>} : vector<60x16xi32>
    %c32_i32_12 = arith.constant 32 : i32
    %c0_i32_13 = arith.constant 0 : i32
    %31 = arith.cmpi eq, %c32_i32_12, %c0_i32_13 : i32
    %c1_i32_14 = arith.constant 1 : i32
    %32 = arith.select %31, %c1_i32_14, %c32_i32_12 : i32
    %33 = vector.broadcast %32 : i32 to vector<60x16xi32>
    %34 = arith.remsi %30, %33 : vector<60x16xi32>
    %c0_i32_15 = arith.constant 0 : i32
    %35 = vector.broadcast %c0_i32_15 : i32 to vector<60x16xi32>
    %36 = arith.cmpi ne, %34, %35 : vector<60x16xi32>
    %c0_i32_16 = arith.constant 0 : i32
    %37 = vector.broadcast %c0_i32_16 : i32 to vector<60x16xi32>
    %38 = arith.cmpi slt, %34, %37 : vector<60x16xi32>
    %c0_i32_17 = arith.constant 0 : i32
    %39 = arith.cmpi slt, %32, %c0_i32_17 : i32
    %40 = vector.broadcast %39 : i1 to vector<60x16xi1>
    %41 = vector.broadcast %40 : vector<60x16xi1> to vector<60x16xi1>
    %42 = arith.xori %38, %41 : vector<60x16xi1>
    %43 = arith.andi %42, %36 : vector<60x16xi1>
    %44 = vector.broadcast %32 : i32 to vector<60x16xi32>
    %45 = arith.addi %34, %44 : vector<60x16xi32>
    %46 = arith.select %43, %45, %34 : vector<60x16xi1>, vector<60x16xi32>
    %c28_i32 = arith.constant 28 : i32
    %47 = vector.broadcast %c28_i32 : i32 to vector<60x16xi32>
    %48 = arith.cmpi slt, %46, %47 : vector<60x16xi32>
    %49 = arith.extui %48 : vector<60x16xi1> to vector<60x16xi32>
    %50 = arith.sitofp %49 : vector<60x16xi32> to vector<60x16xf32>
    %c0_18 = arith.constant 0 : index
    %c0_19 = arith.constant 0 : index
    %51 = vector.load %arg0[%c0_18, %c0_19] : memref<64x8xf32, #tpu.memory_space<vmem>>, vector<64x8xf32>
    %c0_20 = arith.constant 0 : index
    %c0_21 = arith.constant 0 : index
    %52 = vector.load %arg1[%c0_20, %c0_21] : memref<8x16xf32, #tpu.memory_space<vmem>>, vector<8x16xf32>
    %cst = arith.constant dense<0.000000e+00> : vector<64x16xf32>
    %53 = tpu.matmul %51, %52, %cst {dimension_numbers = #tpu.dot_dimension_numbers<[1], [0], [0], [1], [0, 0, 1, 1], [], []>} : vector<64x8xf32>, vector<8x16xf32>, vector<64x16xf32> -> vector<64x16xf32>
    %54 = vector.broadcast %0 : vector<1x16xf32> to vector<64x16xf32>
    %55 = arith.addf %53, %54 : vector<64x16xf32>
    %cst_22 = arith.constant dense<0.000000e+00> : vector<16xf32>
    %56 = vector.multi_reduction <add>, %55, %cst_22 [0] : vector<64x16xf32> to vector<16xf32>
    %57 = vector.shape_cast %56 : vector<16xf32> to vector<1x16xf32>
    %cst_23 = arith.constant 6.400000e+01 : f32
    %58 = vector.broadcast %cst_23 : f32 to vector<1x16xf32>
    %59 = arith.divf %57, %58 : vector<1x16xf32>
    %60 = vector.broadcast %59 : vector<1x16xf32> to vector<64x16xf32>
    %61 = arith.subf %55, %60 : vector<64x16xf32>
    %62 = arith.mulf %61, %61 : vector<64x16xf32>
    %cst_24 = arith.constant dense<0.000000e+00> : vector<16xf32>
    %63 = vector.multi_reduction <add>, %62, %cst_24 [0] : vector<64x16xf32> to vector<16xf32>
    %64 = vector.shape_cast %63 : vector<16xf32> to vector<1x16xf32>
    %cst_25 = arith.constant 6.400000e+01 : f32
    %65 = vector.broadcast %cst_25 : f32 to vector<1x16xf32>
    %66 = arith.divf %64, %65 : vector<1x16xf32>
    %cst_26 = arith.constant 9.99999974E-6 : f32
    %67 = vector.broadcast %cst_26 : f32 to vector<1x16xf32>
    %68 = arith.addf %66, %67 : vector<1x16xf32>
    %69 = math.rsqrt %68 : vector<1x16xf32>
    %70 = arith.mulf %3, %69 : vector<1x16xf32>
    %71 = arith.mulf %59, %70 : vector<1x16xf32>
    %72 = arith.subf %4, %71 : vector<1x16xf32>
    %73 = vector.broadcast %70 : vector<1x16xf32> to vector<64x16xf32>
    %74 = arith.mulf %55, %73 : vector<64x16xf32>
    %75 = vector.broadcast %72 : vector<1x16xf32> to vector<64x16xf32>
    %76 = arith.addf %74, %75 : vector<64x16xf32>
    %77 = vector.extract_strided_slice %76 {offsets = [0, 0], sizes = [62, 16], strides = [1, 1]} : vector<64x16xf32> to vector<62x16xf32>
    %78 = vector.extract_strided_slice %76 {offsets = [1, 0], sizes = [62, 16], strides = [1, 1]} : vector<64x16xf32> to vector<62x16xf32>
    %79 = vector.extract_strided_slice %76 {offsets = [2, 0], sizes = [62, 16], strides = [1, 1]} : vector<64x16xf32> to vector<62x16xf32>
    %80 = tpu.concatenate %77, %78, %79 in 1 : vector<62x16xf32>, vector<62x16xf32>, vector<62x16xf32> -> vector<62x48xf32>
    %c0_27 = arith.constant 0 : index
    %c0_28 = arith.constant 0 : index
    %81 = vector.load %arg2[%c0_27, %c0_28] : memref<48x16xf32, #tpu.memory_space<vmem>>, vector<48x16xf32>
    %cst_29 = arith.constant dense<0.000000e+00> : vector<62x16xf32>
    %82 = tpu.matmul %80, %81, %cst_29 {dimension_numbers = #tpu.dot_dimension_numbers<[1], [0], [0], [1], [0, 0, 1, 1], [], []>} : vector<62x48xf32>, vector<48x16xf32>, vector<62x16xf32> -> vector<62x16xf32>
    %83 = vector.broadcast %1 : vector<1x16xf32> to vector<62x16xf32>
    %84 = arith.addf %82, %83 : vector<62x16xf32>
    %85 = arith.mulf %84, %29 : vector<62x16xf32>
    %cst_30 = arith.constant dense<0.000000e+00> : vector<16xf32>
    %86 = vector.multi_reduction <add>, %85, %cst_30 [0] : vector<62x16xf32> to vector<16xf32>
    %87 = vector.shape_cast %86 : vector<16xf32> to vector<1x16xf32>
    %cst_31 = arith.constant 0.0166666675 : f32
    %88 = vector.broadcast %cst_31 : f32 to vector<1x16xf32>
    %89 = arith.mulf %87, %88 : vector<1x16xf32>
    %90 = vector.broadcast %89 : vector<1x16xf32> to vector<62x16xf32>
    %91 = arith.subf %84, %90 : vector<62x16xf32>
    %92 = arith.mulf %91, %29 : vector<62x16xf32>
    %93 = arith.mulf %92, %92 : vector<62x16xf32>
    %cst_32 = arith.constant dense<0.000000e+00> : vector<16xf32>
    %94 = vector.multi_reduction <add>, %93, %cst_32 [0] : vector<62x16xf32> to vector<16xf32>
    %95 = vector.shape_cast %94 : vector<16xf32> to vector<1x16xf32>
    %cst_33 = arith.constant 0.0166666675 : f32
    %96 = vector.broadcast %cst_33 : f32 to vector<1x16xf32>
    %97 = arith.mulf %95, %96 : vector<1x16xf32>
    %cst_34 = arith.constant 9.99999974E-6 : f32
    %98 = vector.broadcast %cst_34 : f32 to vector<1x16xf32>
    %99 = arith.addf %97, %98 : vector<1x16xf32>
    %100 = math.rsqrt %99 : vector<1x16xf32>
    %101 = arith.mulf %5, %100 : vector<1x16xf32>
    %102 = arith.mulf %89, %101 : vector<1x16xf32>
    %103 = arith.subf %6, %102 : vector<1x16xf32>
    %104 = vector.broadcast %101 : vector<1x16xf32> to vector<62x16xf32>
    %105 = arith.mulf %84, %104 : vector<62x16xf32>
    %106 = vector.broadcast %103 : vector<1x16xf32> to vector<62x16xf32>
    %107 = arith.addf %105, %106 : vector<62x16xf32>
    %cst_35 = arith.constant 0.000000e+00 : f32
    %108 = vector.broadcast %cst_35 : f32 to vector<62x16xf32>
    %109 = arith.cmpf ogt, %107, %108 : vector<62x16xf32>
    %cst_36 = arith.constant 0.00999999977 : f32
    %110 = vector.broadcast %cst_36 : f32 to vector<62x16xf32>
    %111 = arith.mulf %110, %107 : vector<62x16xf32>
    %112 = arith.select %109, %107, %111 : vector<62x16xi1>, vector<62x16xf32>
    %113 = vector.extract_strided_slice %112 {offsets = [0, 0], sizes = [60, 16], strides = [1, 1]} : vector<62x16xf32> to vector<60x16xf32>
    %114 = vector.extract_strided_slice %112 {offsets = [1, 0], sizes = [60, 16], strides = [1, 1]} : vector<62x16xf32> to vector<60x16xf32>
    %115 = vector.extract_strided_slice %112 {offsets = [2, 0], sizes = [60, 16], strides = [1, 1]} : vector<62x16xf32> to vector<60x16xf32>
    %116 = tpu.concatenate %113, %114, %115 in 1 : vector<60x16xf32>, vector<60x16xf32>, vector<60x16xf32> -> vector<60x48xf32>
    %c0_37 = arith.constant 0 : index
    %c0_38 = arith.constant 0 : index
    %117 = vector.load %arg3[%c0_37, %c0_38] : memref<48x16xf32, #tpu.memory_space<vmem>>, vector<48x16xf32>
    %cst_39 = arith.constant dense<0.000000e+00> : vector<60x16xf32>
    %118 = tpu.matmul %116, %117, %cst_39 {dimension_numbers = #tpu.dot_dimension_numbers<[1], [0], [0], [1], [0, 0, 1, 1], [], []>} : vector<60x48xf32>, vector<48x16xf32>, vector<60x16xf32> -> vector<60x16xf32>
    %119 = vector.broadcast %2 : vector<1x16xf32> to vector<60x16xf32>
    %120 = arith.addf %118, %119 : vector<60x16xf32>
    %121 = arith.mulf %120, %50 : vector<60x16xf32>
    %cst_40 = arith.constant dense<0.000000e+00> : vector<16xf32>
    %122 = vector.multi_reduction <add>, %121, %cst_40 [0] : vector<60x16xf32> to vector<16xf32>
    %123 = vector.shape_cast %122 : vector<16xf32> to vector<1x16xf32>
    %cst_41 = arith.constant 0.0178571437 : f32
    %124 = vector.broadcast %cst_41 : f32 to vector<1x16xf32>
    %125 = arith.mulf %123, %124 : vector<1x16xf32>
    %126 = vector.broadcast %125 : vector<1x16xf32> to vector<60x16xf32>
    %127 = arith.subf %120, %126 : vector<60x16xf32>
    %128 = arith.mulf %127, %50 : vector<60x16xf32>
    %129 = arith.mulf %128, %128 : vector<60x16xf32>
    %cst_42 = arith.constant dense<0.000000e+00> : vector<16xf32>
    %130 = vector.multi_reduction <add>, %129, %cst_42 [0] : vector<60x16xf32> to vector<16xf32>
    %131 = vector.shape_cast %130 : vector<16xf32> to vector<1x16xf32>
    %cst_43 = arith.constant 0.0178571437 : f32
    %132 = vector.broadcast %cst_43 : f32 to vector<1x16xf32>
    %133 = arith.mulf %131, %132 : vector<1x16xf32>
    %cst_44 = arith.constant 9.99999974E-6 : f32
    %134 = vector.broadcast %cst_44 : f32 to vector<1x16xf32>
    %135 = arith.addf %133, %134 : vector<1x16xf32>
    %136 = math.rsqrt %135 : vector<1x16xf32>
    %137 = arith.mulf %7, %136 : vector<1x16xf32>
    %138 = arith.mulf %125, %137 : vector<1x16xf32>
    %139 = arith.subf %8, %138 : vector<1x16xf32>
    %140 = vector.broadcast %137 : vector<1x16xf32> to vector<60x16xf32>
    %141 = arith.mulf %120, %140 : vector<60x16xf32>
    %142 = vector.broadcast %139 : vector<1x16xf32> to vector<60x16xf32>
    %143 = arith.addf %141, %142 : vector<60x16xf32>
    %144 = vector.extract_strided_slice %76 {offsets = [2, 0], sizes = [60, 16], strides = [1, 1]} : vector<64x16xf32> to vector<60x16xf32>
    %145 = arith.addf %143, %144 : vector<60x16xf32>
    %cst_45 = arith.constant 0.000000e+00 : f32
    %146 = vector.broadcast %cst_45 : f32 to vector<60x16xf32>
    %147 = arith.cmpf ogt, %145, %146 : vector<60x16xf32>
    %cst_46 = arith.constant 0.00999999977 : f32
    %148 = vector.broadcast %cst_46 : f32 to vector<60x16xf32>
    %149 = arith.mulf %148, %145 : vector<60x16xf32>
    %150 = arith.select %147, %145, %149 : vector<60x16xi1>, vector<60x16xf32>
    %c0_47 = arith.constant 0 : index
    %c0_48 = arith.constant 0 : index
    %151 = vector.load %arg5[%c0_47, %c0_48] : memref<60x16xf32, #tpu.memory_space<vmem>>, vector<60x16xf32>
    tpu.vector_store %arg5[%c0_47, %c0_48], %150 {strides = array<i32>} : memref<60x16xf32, #tpu.memory_space<vmem>>, vector<60x16xf32>,
    return
  }
}

</mosaic_0001>

<bundles_post_ra>
// kernel: tpu_custom_call.1
= control target key start
LH: loop header
LB: loop body
LE: loop exit
PB: predicated region body
PF: predicated region fallthrough
CT: control target
= control target key end

     0   :  { %vm195_vm0 = vcmask 64512   ;;  %vm325_vm1 = vcmask 130048   ;;  %vm424_vm2 = vcmask 1046528   ;;  %vm464_vm3 = vcmask 1045504   ;;  %s1356_s27 = smov 32   ;;  %s1931_s1 = inlined_call_operand.vmem [shape: f32[8,16], index: 1, kind: input, shape index: {}]   ;;  %s1932_s0 = inlined_call_operand.vmem [shape: f32[64,8], index: 0, kind: input, shape index: {}]   ;;  %s1933_s2 = inlined_call_operand.vmem [shape: f32[48,16], index: 2, kind: input, shape index: {}]   ;;  %s1934_s4 = inlined_call_operand.vmem [shape: f32[9,16], index: 4, kind: input, shape index: {}]   ;;  %s1935_s3 = inlined_call_operand.vmem [shape: f32[48,16], index: 3, kind: input, shape index: {}]   ;;  %s1936_s5 = inlined_call_operand.vmem [shape: f32[60,16], index: 5, kind: output, shape index: {}]  }
   0x1   :  { %v190_v0 = vld [vmem:[%s1931_s1] sm:$0xff]  ;;  %v183_v2 = vld [vmem:[%s1932_s0 + $0x8] sm:$0xff]  ;;  %v184_v3 = vld [vmem:[%s1932_s0 + $0x10] sm:$0xff]  ;;  %vm512_vm4 = vcmask 261120   ;;  %vm531_vm5 = vcmask 392192   ;;  %vm682_vm8 = vcmask 128000  }
   0x2   :  { %v182_v1 = vld [vmem:[%s1932_s0] sm:$0xff]  ;;  %1258 = vmatprep.subr.mxu0 %v190_v0  ;;  %1344 = vmatprep.subr.mxu1 %v190_v0  ;;  %v188_v4 = vld [vmem:[%s1932_s0 + $0x30] sm:$0xff]  ;;  %v189_v5 = vld [vmem:[%s1932_s0 + $0x38] sm:$0xff] }
   0x3   :  { %1260 = vmatprep.mubr.msk.f32.mxu0 %vm195_vm0, %v182_v1  ;;  %1259 = vmatpush3.msra.mxu0 %v190_v0  ;;  %v185_v6 = vld [vmem:[%s1932_s0 + $0x18] sm:$0xff]  ;;  %v186_v7 = vld [vmem:[%s1932_s0 + $0x20] sm:$0xff]  ;;  %v187_v8 = vld [vmem:[%s1932_s0 + $0x28] sm:$0xff] }
   0x4   :  { %1261 = vmatmul.mubr.msk.f32.vlgmr.msra.gmra.mrb[0].mxu0 %vm195_vm0, %v183_v2  ;;  %1345 = vmatpush3.msra.mxu1 %v190_v0  ;;  %v521_v9 = vld [vmem:[%s1933_s2] sm:$0xff]  ;;  %v522_v10 = vld [vmem:[%s1933_s2 + $0x8] sm:$0xff] }
   0x5   :  { %1263 = vmatprep.mubr.msk.f32.mxu0 %vm195_vm0, %v184_v3  ;;  %1269 = vmatprep.mubr.msk.f32.mxu1 %vm195_vm0, %v188_v4  ;;  %v1320_v11 = vpack.c.bf16 %v522_v10, %v521_v9  ;;  %v1194_v12 = vld [vmem:[%s1934_s4] ss:$0 sm:$0xff] }
   0x6   :  { %1270 = vmatmul.mubr.msk.f32.vlgmr.msra.gmra.mrb[0].mxu1 %vm195_vm0, %v189_v5 }
   0x7   :  { %1321 = vmatprep.subr.bf16.mxu1 %v1320_v11 }
   0x8   :  { %1264 = vmatmul.mubr.msk.f32.gmra.mrb[2].mxu0 %vm195_vm0, %v185_v6  ;;  %1323 = vmatpush3.bf16.msra.mxu1 %v1320_v11 }
   0x9   :  { %1266 = vmatprep.mubr.msk.f32.mxu0 %vm195_vm0, %v186_v7 }
   0xc   :  { %1267 = vmatmul.mubr.msk.f32.gmra.mrb[4].mxu0 %vm195_vm0, %v187_v8 }
  0xd7   :  { %v1262_v13 = vpop.f32.mrb[0].mxu0 }
  0xd8   :  { %v1432_v14 = vadd.f32 %v1262_v13, %v1194_v12  ;;  %v286_v15 = vpop.f32.mrb[1].mxu0 }
  0xd9   :  { %v1434_v16 = vadd.f32 %v1194_v12, %v286_v15  ;;  %v1271_v17 = vpop.f32.mrb[0].mxu1 }
  0xda   :  { %v316_v18 = vpop.f32.mrb[1].mxu1  ;;  %v327_v19 = vsel %vm325_vm1, %v1432_v14, 0.0  ;;  %v1458_v38 = vadd.f32 %v1271_v17, %v1194_v12 }
  0xdb   :  { %v326_v20 = vsel %vm325_vm1, %v1434_v16, 0.0  ;;  %v1265_v21 = vpop.f32.mrb[2].mxu0  ;;  %v1452_v33 = vadd.f32 %v1194_v12, %v316_v18 }
  0xdc   :  { %v296_v22 = vpop.f32.mrb[3].mxu0  ;;  %v1440_v23 = vadd.f32 %v1265_v21, %v1194_v12  ;;  %v328_v25 = vadd.f32 %v327_v19, %v326_v20  ;;  %v339_v42 = vsel %vm325_vm1, %v1458_v38, 0.0 }
  0xdd   :  { %v1442_v24 = vadd.f32 %v1194_v12, %v296_v22  ;;  %v337_v39 = vsel %vm325_vm1, %v1452_v33, 0.0 }
  0xde   :  { %v331_v30 = vsel %vm325_vm1, %v1440_v23, 0.0 }
  0xdf   :  { %v329_v26 = vsel %vm325_vm1, %v1442_v24, 0.0  ;;  %v1268_v27 = vpop.f32.mrb[4].mxu0 }
  0xe0   :  { %v330_v28 = vadd.f32 %v329_v26, %v328_v25  ;;  %v306_v29 = vpop.f32.mrb[5].mxu0  ;;  %v1448_v31 = vadd.f32 %v1268_v27, %v1194_v12 }
  0xe1   :  { %v1450_v32 = vadd.f32 %v1194_v12, %v306_v29 }
  0xe2   :  { %v332_v34 = vadd.f32 %v331_v30, %v330_v28  ;;  %v335_v37 = vsel %vm325_vm1, %v1448_v31, 0.0  ;;  %v29_v30 = vlaneseq }
  0xe3   :  { %v333_v35 = vsel %vm325_vm1, %v1450_v32, 0.0 }
  0xe4   :  { %v334_v36 = vadd.f32 %v333_v35, %v332_v34  ;;  %v1480_v34 = vshrl.u32 %v29_v30, 7  ;;  %v23_v35 = vld [vmem:[%s1934_s4 + $0x3] sm:$0x1] }
  0xe6   :  { %v336_v40 = vadd.f32 %v335_v37, %v334_v36  ;;  %v1486_v36 = vsub.s32 0, %v1480_v34 }
  0xe8   :  { %v338_v41 = vadd.f32 %v337_v39, %v336_v40  ;;  %v523_v40 = vld [vmem:[%s1933_s2 + $0x10] sm:$0xff] }
  0xea   :  { %v340_v43 = vadd.f32 %v339_v42, %v338_v41  ;;  %v524_v41 = vld [vmem:[%s1933_s2 + $0x18] sm:$0xff]  ;;  %v24_v42 = vld [vmem:[%s1934_s4 + $0x4] sm:$0x1] }
  0xec   :  { %v341_v44 = vrot.slane %v340_v43, 4 }
  0xee   :  { %v342_v45 = vadd.f32 %v341_v44, %v340_v43  ;;  %v1324_v43 = vpack.c.bf16 %v524_v41, %v523_v40 }
  0xf0   :  { %v343_v46 = vrot.slane %v342_v45, 2  ;;  %1325 = vmatprep.subr.bf16.mxu1 %v1324_v43 }
  0xf1   :  { %1327 = vmatpush3.bf16.msra.mxu1 %v1324_v43 }
  0xf2   :  { %v344_v47 = vadd.f32 %v343_v46, %v342_v45 }
  0xf4   :  { %v345_v48 = vrot.slane %v344_v47, 1 }
  0xf6   :  { %v346_v49 = vadd.f32 %v345_v48, %v344_v47  ;;  %v525_v47 = vld [vmem:[%s1933_s2 + $0x20] sm:$0xff]  ;;  %v526_v48 = vld [vmem:[%s1933_s2 + $0x28] sm:$0xff]  ;;  %s1355_s2 = smov 16  }
  0xf8   :  { %v348_v50 = vmul.f32 0.015625, %v346_v49 }
  0xfa   :  { %v349_v51 = vsub.f32 %v1434_v16, %v348_v50  ;;  %v350_v52 = vsub.f32 %v1432_v14, %v348_v50  ;;  %v351_v53 = vsub.f32 %v1442_v24, %v348_v50  ;;  %v352_v54 = vsub.f32 %v1440_v23, %v348_v50 }
  0xfb   :  { %v353_v55 = vsub.f32 %v1450_v32, %v348_v50  ;;  %v354_v59 = vsub.f32 %v1448_v31, %v348_v50  ;;  %v355_v0 = vsub.f32 %v1452_v33, %v348_v50  ;;  %v356_v4 = vsub.f32 %v1458_v38, %v348_v50 }
  0xfc   :  { %v357_v56 = vmul.f32 %v349_v51, %v349_v51  ;;  %v358_v57 = vmul.f32 %v350_v52, %v350_v52  ;;  %v359_v58 = vmul.f32 %v351_v53, %v351_v53  ;;  %v360_v60 = vmul.f32 %v352_v54, %v352_v54 }
  0xfd   :  { %v361_v1 = vmul.f32 %v353_v55, %v353_v55  ;;  %v362_v5 = vmul.f32 %v354_v59, %v354_v59  ;;  %v363_v8 = vmul.f32 %v355_v0, %v355_v0  ;;  %v364_v11 = vmul.f32 %v356_v4, %v356_v4 }
  0xfe   :  { %v365_v61 = vsel %vm325_vm1, %v357_v56, 0.0  ;;  %v366_v62 = vsel %vm325_vm1, %v358_v57, 0.0  ;;  %v368_v2 = vsel %vm325_vm1, %v359_v58, 0.0  ;;  %v370_v6 = vsel %vm325_vm1, %v360_v60, 0.0 }
  0xff   :  { %v367_v63 = vadd.f32 %v366_v62, %v365_v61  ;;  %v372_v9 = vsel %vm325_vm1, %v361_v1, 0.0  ;;  %v374_v12 = vsel %vm325_vm1, %v362_v5, 0.0  ;;  %v376_v15 = vsel %vm325_vm1, %v363_v8, 0.0 }
 0x100   :  { %v378_v18 = vsel %vm325_vm1, %v364_v11, 0.0  ;;  %v1328_v53 = vpack.c.bf16 %v526_v48, %v525_v47 }
 0x101   :  { %v369_v3 = vadd.f32 %v368_v2, %v367_v63 }
 0x102   :  { %1329 = vmatprep.subr.bf16.mxu1 %v1328_v53 }
 0x103   :  { %v371_v7 = vadd.f32 %v370_v6, %v369_v3  ;;  %1331 = vmatpush3.bf16.msra.mxu1 %v1328_v53 }
 0x105   :  { %v373_v10 = vadd.f32 %v372_v9, %v371_v7 }
 0x107   :  { %v375_v13 = vadd.f32 %v374_v12, %v373_v10 }
 0x109   :  { %v377_v17 = vadd.f32 %v376_v15, %v375_v13 }
 0x10b   :  { %v379_v19 = vadd.f32 %v378_v18, %v377_v17 }
 0x10d   :  { %v380_v20 = vrot.slane %v379_v19, 4 }
 0x10f   :  { %v381_v21 = vadd.f32 %v380_v20, %v379_v19 }
 0x111   :  { %v382_v22 = vrot.slane %v381_v21, 2 }
 0x113   :  { %v383_v25 = vadd.f32 %v382_v22, %v381_v21 }
 0x115   :  { %v384_v26 = vrot.slane %v383_v25, 1 }
 0x117   :  { %v385_v27 = vadd.f32 %v384_v26, %v383_v25 }
 0x119   :  { %v386_v28 = vmul.f32 0.015625, %v385_v27 }
 0x11b   :  { %v387_v29 = vadd.f32 1e-05, %v386_v28 }
 0x11d   :  { %1349 = vrsqrt.f32 %v387_v29 }
 0x127   :  { %v1350_v37 = vpop.eup %1349 }
 0x128   :  { %v389_v39 = vmul.f32 %v1350_v37, %v23_v35 }
 0x12a   :  { %v390_v44 = vmul.f32 %v389_v39, %v348_v50  ;;  %v395_v45 = vrot.slane %v389_v39, %v1486_v36 }
 0x12c   :  { %v391_v46 = vsub.f32 %v24_v42, %v390_v44  ;;  %v403_v49 = vmul.f32 %v395_v45, %v1458_v38  ;;  %v396_v52 = vmul.f32 %v395_v45, %v1434_v16  ;;  %v397_v50 = vmul.f32 %v395_v45, %v1432_v14 }
 0x12d   :  { %v398_v54 = vmul.f32 %v395_v45, %v1442_v24  ;;  %v399_v59 = vmul.f32 %v395_v45, %v1440_v23  ;;  %v400_v0 = vmul.f32 %v395_v45, %v1450_v32  ;;  %v401_v5 = vmul.f32 %v395_v45, %v1448_v31 }
 0x12e   :  { %v407_v51 = vrot.slane %v391_v46, %v1486_v36  ;;  %v402_v10 = vmul.f32 %v395_v45, %v1452_v33 }
 0x130   :  { %v1509_v55 = vadd.f32 %v407_v51, %v403_v49  ;;  %v1511_v56 = vadd.f32 %v407_v51, %v396_v52  ;;  %v1513_v57 = vadd.f32 %v407_v51, %v397_v50  ;;  %v1515_v58 = vadd.f32 %v407_v51, %v398_v54 }
 0x131   :  { %v1526_v63 = vadd.f32 %v407_v51, %v399_v59  ;;  %v1534_v2 = vadd.f32 %v407_v51, %v400_v0  ;;  %v413_v9 = vadd.f32 %v407_v51, %v401_v5  ;;  %v414_v11 = vadd.f32 %v407_v51, %v402_v10 }
 0x132   :  { %v438_v38 = vrot.slane %v1509_v55, 1  ;;  %v425_v16 = vrot.slane %v1511_v56, 1  ;;  %v426_v14 = vrot.slane %v1513_v57, 1  ;;  %v465_v24 = vrot.slane %v1511_v56, 2 }
 0x133   :  { %v466_v60 = vrot.slane %v1513_v57, 2  ;;  %v428_v62 = vrot.slane %v1515_v58, 1  ;;  %v468_v1 = vrot.slane %v1515_v58, 2  ;;  %v430_v4 = vrot.slane %v1526_v63, 1 }
 0x134   :  { %454 = vrot.lane.b32.xlu1 %v438_v38, %s1355_s2  ;;  %v427_v61 = vsel %vm424_vm2, %v425_v16, %v426_v14  ;;  %v432_v6 = vrot.slane %v1534_v2, 1  ;;  %v470_v8 = vrot.slane %v1526_v63, 2  ;;  %v472_v12 = vrot.slane %v1534_v2, 2 }
 0x135   :  { %440 = vrot.lane.b32.xlu0 %v427_v61, %s1355_s2  ;;  %v1531_v23 = vsel %vm464_vm3, %v465_v24, %v466_v60  ;;  %v429_v3 = vsel %vm424_vm2, %v426_v14, %v428_v62  ;;  %v1543_v32 = vsel %vm464_vm3, %v466_v60, %v468_v1  ;;  %v431_v7 = vsel %vm424_vm2, %v428_v62, %v430_v4 }
 0x136   :  { %v433_v31 = vsel %vm424_vm2, %v430_v4, %v432_v6  ;;  %v1556_v13 = vsel %vm464_vm3, %v468_v1, %v470_v8  ;;  %v434_v15 = vrot.slane %v413_v9, 1  ;;  %v1561_v17 = vsel %vm464_vm3, %v470_v8, %v472_v12  ;;  %v1203_v4 = vld [vmem:[%s1934_s4 + $0x1] ss:$0 sm:$0xff] }
 0x137   :  { %v436_v33 = vrot.slane %v414_v11, 1  ;;  %v474_v19 = vrot.slane %v413_v9, 2  ;;  %v476_v21 = vrot.slane %v414_v11, 2  ;;  %v1581_v27 = vrot.slane %v1509_v55, 2 }
 0x138   :  { %480 = vrot.lane.b32.xlu1 %v1531_v23, %s1356_s27  ;;  %v435_v18 = vsel %vm424_vm2, %v432_v6, %v434_v15  ;;  %v1623_v0 = vadd.s32 24, %v1480_v34 }
 0x139   :  { %442 = vrot.lane.b32.xlu0 %v429_v3, %s1355_s2  ;;  %v437_v20 = vsel %vm424_vm2, %v434_v15, %v436_v33  ;;  %v1570_v22 = vsel %vm464_vm3, %v472_v12, %v474_v19  ;;  %v1575_v25 = vsel %vm464_vm3, %v474_v19, %v476_v21  ;;  %v439_v26 = vsel %vm424_vm2, %v436_v33, %v438_v38 }
 0x13a   :  { %v1588_v28 = vsel %vm464_vm3, %v476_v21, %v1581_v27  ;;  %v63_v3 = vand.u32 31, %v1623_v0  ;;  %v1651_v19 = vadd.s32 56, %v1480_v34 }
 0x13c   :  { %482 = vrot.lane.b32.xlu1 %v1543_v32, %s1356_s27  ;;  %vm137_vm6 = vcmp.lt.s32.totalorder %v63_v3, 30 }
 0x13d   :  { %444 = vrot.lane.b32.xlu0 %v431_v7, %s1355_s2  ;;  %v1357_v7 = vmov 0.0  }
 0x13e   :  { %v1190_v8 = vsel %vm137_vm6, 1.0, %v1357_v7 }
 0x140   :  { %446 = vrot.lane.b32.xlu1 %v433_v31, %s1355_s2  ;;  %v894_v31 = vld [vmem:[%s1935_s3 + $0x8] sm:$0xff] }
 0x141   :  { %484 = vrot.lane.b32.xlu0 %v1556_v13, %s1356_s27 }
 0x144   :  { %486 = vrot.lane.b32.xlu1 %v1561_v17, %s1356_s27 }
 0x145   :  { %448 = vrot.lane.b32.xlu0 %v435_v18, %s1355_s2 }
 0x148   :  { %450 = vrot.lane.b32.xlu1 %v437_v20, %s1355_s2 }
 0x149   :  { %488 = vrot.lane.b32.xlu0 %v1570_v22, %s1356_s27 }
 0x14c   :  { %490 = vrot.lane.b32.xlu1 %v1575_v25, %s1356_s27 }
 0x14d   :  { %452 = vrot.lane.b32.xlu0 %v439_v26, %s1355_s2 }
 0x150   :  { %494 = vrot.lane.b32.xlu1 %v1581_v27, %s1356_s27 }
 0x151   :  { %492 = vrot.lane.b32.xlu0 %v1588_v28, %s1356_s27 }
 0x1a6   :  { %v455_v29 = vpop.permute.xlu1 %454 }
 0x1a7   :  { %v441_v30 = vpop.permute.xlu0 %440  ;;  %v511_v61 = vsel %vm325_vm1, %v1509_v55, %v455_v29 }
 0x1a8   :  { %v504_v35 = vsel %vm325_vm1, %v1511_v56, %v441_v30  ;;  %v91_v30 = vand.u32 31, %v1651_v19 }
 0x1aa   :  { %v481_v37 = vpop.permute.xlu1 %480  ;;  %vm141_vm7 = vcmp.lt.s32.totalorder %v91_v30, 30 }
 0x1ab   :  { %v513_v39 = vsel %vm512_vm4, %v504_v35, %v481_v37  ;;  %v443_v40 = vpop.permute.xlu0 %442 }
 0x1ac   :  { %1284 = vmatprep.mubr.msk.f32.mxu1 %vm531_vm5, %v513_v39  ;;  %v505_v41 = vsel %vm325_vm1, %v1513_v57, %v443_v40 }
 0x1ae   :  { %v483_v42 = vpop.permute.xlu1 %482 }
 0x1af   :  { %v514_v43 = vsel %vm512_vm4, %v505_v41, %v483_v42  ;;  %v445_v44 = vpop.permute.xlu0 %444 }
 0x1b0   :  { %1285 = vmatmul.mubr.msk.f32.vlgmr.msra.gmra.mrb[2].mxu1 %vm531_vm5, %v514_v43  ;;  %v506_v46 = vsel %vm325_vm1, %v1515_v58, %v445_v44  ;;  %v1191_v44 = vsel %vm141_vm7, 1.0, %v1357_v7 }
 0x1b2   :  { %v447_v45 = vpop.permute.xlu1 %446 }
 0x1b3   :  { %v485_v47 = vpop.permute.xlu0 %484  ;;  %v507_v49 = vsel %vm325_vm1, %v1526_v63, %v447_v45 }
 0x1b4   :  { %v515_v48 = vsel %vm512_vm4, %v506_v46, %v485_v47 }
 0x1b5   :  { %1287 = vmatprep.mubr.msk.f32.mxu1 %vm531_vm5, %v515_v48 }
 0x1b6   :  { %v487_v51 = vpop.permute.xlu1 %486 }
 0x1b7   :  { %v516_v52 = vsel %vm512_vm4, %v507_v49, %v487_v51  ;;  %v449_v50 = vpop.permute.xlu0 %448 }
 0x1b8   :  { %1288 = vmatmul.mubr.msk.f32.gmra.mrb[4].mxu1 %vm531_vm5, %v516_v52  ;;  %v508_v54 = vsel %vm325_vm1, %v1534_v2, %v449_v50 }
 0x1ba   :  { %v451_v53 = vpop.permute.xlu1 %450 }
 0x1bb   :  { %v489_v56 = vpop.permute.xlu0 %488  ;;  %v509_v58 = vsel %vm325_vm1, %v413_v9, %v451_v53 }
 0x1bc   :  { %v517_v57 = vsel %vm512_vm4, %v508_v54, %v489_v56 }
 0x1bd   :  { %1290 = vmatprep.mubr.msk.f32.mxu1 %vm531_vm5, %v517_v57 }
 0x1be   :  { %v491_v38 = vpop.permute.xlu1 %490 }
 0x1bf   :  { %v518_v16 = vsel %vm512_vm4, %v509_v58, %v491_v38  ;;  %v453_v14 = vpop.permute.xlu0 %452 }
 0x1c0   :  { %1291 = vmatmul.mubr.msk.f32.gmra.mrb[6].mxu1 %vm531_vm5, %v518_v16  ;;  %v510_v24 = vsel %vm325_vm1, %v414_v11, %v453_v14  ;;  %v893_v11 = vld [vmem:[%s1935_s3] sm:$0xff] }
 0x1c1   :  { %v1332_v18 = vpack.c.bf16 %v894_v31, %v893_v11 }
 0x1c2   :  { %v495_v59 = vpop.permute.xlu1 %494 }
 0x1c3   :  { %v493_v60 = vpop.permute.xlu0 %492  ;;  %v520_v63 = vsel %vm512_vm4, %v511_v61, %v495_v59  ;;  %1333 = vmatprep.subr.bf16.mxu0 %v1332_v18 }
 0x1c4   :  { %v519_v62 = vsel %vm512_vm4, %v510_v24, %v493_v60  ;;  %1335 = vmatpush3.bf16.msra.mxu0 %v1332_v18 }
 0x1c5   :  { %1293 = vmatprep.mubr.msk.f32.mxu1 %vm531_vm5, %v519_v62 }
 0x1c6   :  { %1294 = vmatmul.mubr.msk.f32.gmra.mrb[8].mxu1 %vm531_vm5, %v520_v63 }
 0x283   :  { %v1286_v1 = vpop.f32.mrb[2].mxu1 }
 0x284   :  { %v622_v2 = vpop.f32.mrb[3].mxu1  ;;  %v1629_v55 = vadd.f32 %v1286_v1, %v1203_v4 }
 0x285   :  { %v1631_v5 = vadd.f32 %v1203_v4, %v622_v2 }
 0x286   :  { %v670_v12 = vsel %vm325_vm1, %v1629_v55, 0.0 }
 0x287   :  { %v669_v15 = vsel %vm325_vm1, %v1631_v5, 0.0 }
 0x288   :  { %v671_v26 = vadd.f32 %v670_v12, %v669_v15 }
 0x28b   :  { %v1289_v6 = vpop.f32.mrb[4].mxu1 }
 0x28c   :  { %v1636_v9 = vadd.f32 %v1289_v6, %v1203_v4  ;;  %v632_v10 = vpop.f32.mrb[5].mxu1 }
 0x28d   :  { %v1648_v33 = vadd.f32 %v1203_v4, %v632_v10 }
 0x28e   :  { %v664_v20 = vmul.f32 %v1190_v8, %v1636_v9 }
 0x28f   :  { %v672_v21 = vsel %vm325_vm1, %v1648_v33, 0.0 }
 0x290   :  { %v673_v29 = vadd.f32 %v672_v21, %v671_v26  ;;  %v674_v35 = vsel %vm325_vm1, %v664_v20, 0.0 }
 0x292   :  { %v675_v41 = vadd.f32 %v674_v35, %v673_v29 }
 0x293   :  { %v1292_v37 = vpop.f32.mrb[6].mxu1 }
 0x294   :  { %v642_v39 = vpop.f32.mrb[7].mxu1  ;;  %v1662_v34 = vadd.f32 %v1292_v37, %v1203_v4 }
 0x295   :  { %v1658_v40 = vadd.f32 %v1203_v4, %v642_v39 }
 0x296   :  { %v678_v48 = vsel %vm325_vm1, %v1662_v34, 0.0 }
 0x297   :  { %v676_v42 = vsel %vm325_vm1, %v1658_v40, 0.0 }
 0x298   :  { %v677_v43 = vadd.f32 %v676_v42, %v675_v41 }
 0x299   :  { %v1295_v45 = vpop.f32.mrb[8].mxu1 }
 0x29a   :  { %v1667_v46 = vadd.f32 %v1295_v45, %v1203_v4  ;;  %v652_v47 = vpop.f32.mrb[9].mxu1  ;;  %v679_v52 = vadd.f32 %v678_v48, %v677_v43 }
 0x29b   :  { %v1671_v49 = vadd.f32 %v1203_v4, %v652_v47 }
 0x29c   :  { %v668_v51 = vmul.f32 %v1191_v44, %v1667_v46 }
 0x29d   :  { %v680_v50 = vsel %vm325_vm1, %v1671_v49, 0.0 }
 0x29e   :  { %v683_v53 = vsel %vm682_vm8, %v668_v51, 0.0  ;;  %v681_v54 = vadd.f32 %v680_v50, %v679_v52 }
 0x2a0   :  { %v684_v56 = vadd.f32 %v683_v53, %v681_v54 }
 0x2a2   :  { %v685_v57 = vrot.slane %v684_v56, 4 }
 0x2a4   :  { %v686_v58 = vadd.f32 %v685_v57, %v684_v56 }
 0x2a6   :  { %v687_v38 = vrot.slane %v686_v58, 2 }
 0x2a8   :  { %v688_v16 = vadd.f32 %v687_v38, %v686_v58 }
 0x2aa   :  { %v689_v14 = vrot.slane %v688_v16, 1 }
 0x2ac   :  { %v690_v59 = vadd.f32 %v689_v14, %v688_v16 }
 0x2ae   :  { %v691_v24 = vmul.f32 0.016666668, %v690_v59 }
 0x2b0   :  { %v692_v60 = vsub.f32 %v1631_v5, %v691_v24  ;;  %v693_v61 = vsub.f32 %v1629_v55, %v691_v24  ;;  %v694_v62 = vsub.f32 %v1648_v33, %v691_v24  ;;  %v695_v63 = vsub.f32 %v1636_v9, %v691_v24 }
 0x2b1   :  { %v696_v1 = vsub.f32 %v1658_v40, %v691_v24  ;;  %v697_v11 = vsub.f32 %v1662_v34, %v691_v24  ;;  %v699_v31 = vsub.f32 %v1667_v46, %v691_v24  ;;  %v698_v21 = vsub.f32 %v1671_v49, %v691_v24 }
 0x2b2   :  { %v703_v2 = vmul.f32 %v1190_v8, %v695_v63  ;;  %v708_v4 = vmul.f32 %v692_v60, %v692_v60  ;;  %v709_v6 = vmul.f32 %v693_v61, %v693_v61  ;;  %v710_v10 = vmul.f32 %v694_v62, %v694_v62  ;;  %v25_v60 = vld [vmem:[%s1934_s4 + $0x5] sm:$0x1]  ;;  %v26_v63 = vld [vmem:[%s1934_s4 + $0x6] sm:$0x1] }
 0x2b3   :  { %v712_v26 = vmul.f32 %v696_v1, %v696_v1  ;;  %v707_v8 = vmul.f32 %v1191_v44, %v699_v31  ;;  %v713_v37 = vmul.f32 %v697_v11, %v697_v11  ;;  %v714_v42 = vmul.f32 %v698_v21, %v698_v21 }
 0x2b4   :  { %v711_v12 = vmul.f32 %v703_v2, %v703_v2  ;;  %v716_v15 = vsel %vm325_vm1, %v708_v4, 0.0  ;;  %v717_v18 = vsel %vm325_vm1, %v709_v6, 0.0  ;;  %v719_v29 = vsel %vm325_vm1, %v710_v10, 0.0  ;;  %v895_v6 = vld [vmem:[%s1935_s3 + $0x10] sm:$0xff]  ;;  %v896_v10 = vld [vmem:[%s1935_s3 + $0x18] sm:$0xff] }
 0x2b5   :  { %v718_v20 = vadd.f32 %v717_v18, %v716_v15  ;;  %v723_v43 = vsel %vm325_vm1, %v712_v26, 0.0  ;;  %v715_v47 = vmul.f32 %v707_v8, %v707_v8  ;;  %v725_v48 = vsel %vm325_vm1, %v713_v37, 0.0 }
 0x2b6   :  { %v721_v39 = vsel %vm325_vm1, %v711_v12, 0.0  ;;  %v727_v52 = vsel %vm325_vm1, %v714_v42, 0.0 }
 0x2b7   :  { %v720_v35 = vadd.f32 %v719_v29, %v718_v20  ;;  %v729_v53 = vsel %vm682_vm8, %v715_v47, 0.0 }
 0x2b9   :  { %v722_v41 = vadd.f32 %v721_v39, %v720_v35 }
 0x2bb   :  { %v724_v45 = vadd.f32 %v723_v43, %v722_v41 }
 0x2bd   :  { %v726_v51 = vadd.f32 %v725_v48, %v724_v45 }
 0x2bf   :  { %v728_v50 = vadd.f32 %v727_v52, %v726_v51 }
 0x2c1   :  { %v730_v54 = vadd.f32 %v729_v53, %v728_v50 }
 0x2c3   :  { %v731_v56 = vrot.slane %v730_v54, 4 }
 0x2c5   :  { %v732_v44 = vadd.f32 %v731_v56, %v730_v54 }
 0x2c7   :  { %v733_v57 = vrot.slane %v732_v44, 2 }
 0x2c9   :  { %v734_v58 = vadd.f32 %v733_v57, %v732_v44 }
 0x2cb   :  { %v735_v38 = vrot.slane %v734_v58, 1 }
 0x2cd   :  { %v736_v16 = vadd.f32 %v735_v38, %v734_v58  ;;  %v897_v38 = vld [vmem:[%s1935_s3 + $0x20] sm:$0xff] }
 0x2cf   :  { %v737_v14 = vmul.f32 0.016666668, %v736_v16 }
 0x2d1   :  { %v738_v59 = vadd.f32 1e-05, %v737_v14 }
 0x2d3   :  { %1351 = vrsqrt.f32 %v738_v59 }
 0x2dd   :  { %v1352_v61 = vpop.eup %1351 }
 0x2de   :  { %v740_v62 = vmul.f32 %v1352_v61, %v25_v60 }
 0x2e0   :  { %v741_v1 = vmul.f32 %v740_v62, %v691_v24  ;;  %v746_v2 = vrot.slane %v740_v62, %v1486_v36  ;;  %v1336_v24 = vpack.c.bf16 %v896_v10, %v895_v6 }
 0x2e2   :  { %v742_v4 = vsub.f32 %v26_v63, %v741_v1  ;;  %v754_v11 = vmul.f32 %v746_v2, %v1667_v46  ;;  %v747_v12 = vmul.f32 %v746_v2, %v1631_v5  ;;  %v748_v15 = vmul.f32 %v746_v2, %v1629_v55  ;;  %1337 = vmatprep.subr.bf16.mxu0 %v1336_v24 }
 0x2e3   :  { %v749_v18 = vmul.f32 %v746_v2, %v1648_v33  ;;  %v750_v20 = vmul.f32 %v746_v2, %v1636_v9  ;;  %v751_v35 = vmul.f32 %v746_v2, %v1658_v40  ;;  %1339 = vmatpush3.bf16.msra.mxu0 %v1336_v24  ;;  %v752_v52 = vmul.f32 %v746_v2, %v1662_v34  ;;  %v898_v34 = vld [vmem:[%s1935_s3 + $0x28] sm:$0xff] }
 0x2e4   :  { %v758_v31 = vrot.slane %v742_v4, %v1486_v36  ;;  %v753_v44 = vmul.f32 %v746_v2, %v1671_v49  ;;  %v1340_v62 = vpack.c.bf16 %v898_v34, %v897_v38 }
 0x2e6   :  { %v766_v21 = vadd.f32 %v758_v31, %v754_v11  ;;  %v759_v26 = vadd.f32 %v758_v31, %v747_v12  ;;  %v760_v29 = vadd.f32 %v758_v31, %v748_v15  ;;  %v761_v8 = vadd.f32 %v758_v31, %v749_v18  ;;  %1341 = vmatprep.subr.bf16.mxu0 %v1340_v62 }
 0x2e7   :  { %v762_v37 = vadd.f32 %v758_v31, %v750_v20  ;;  %v763_v5 = vadd.f32 %v758_v31, %v751_v35  ;;  %v764_v58 = vadd.f32 %v758_v31, %v752_v52  ;;  %v765_v59 = vadd.f32 %v758_v31, %v753_v44  ;;  %1343 = vmatpush3.bf16.msra.mxu0 %v1340_v62 }
 0x2e8   :  { %vm774_vm9 = vcmp.gt.f32.partialorder %v766_v21, 0.0  ;;  %v782_v46 = vmul.f32 0.01, %v766_v21  ;;  %vm767_vm10 = vcmp.gt.f32.partialorder %v759_v26, 0.0  ;;  %vm768_vm11 = vcmp.gt.f32.partialorder %v760_v29, 0.0 }
 0x2e9   :  { %v775_v55 = vmul.f32 0.01, %v759_v26  ;;  %v776_v39 = vmul.f32 0.01, %v760_v29  ;;  %vm769_vm12 = vcmp.gt.f32.partialorder %v761_v8, 0.0  ;;  %vm770_vm13 = vcmp.gt.f32.partialorder %v762_v37, 0.0 }
 0x2ea   :  { %v1713_v33 = vsel %vm774_vm9, %v766_v21, %v782_v46  ;;  %v777_v9 = vmul.f32 0.01, %v761_v8  ;;  %v778_v43 = vmul.f32 0.01, %v762_v37  ;;  %vm771_vm14 = vcmp.gt.f32.partialorder %v763_v5, 0.0 }
 0x2eb   :  { %v812_v41 = vrot.slane %v1713_v33, 1  ;;  %v1716_v42 = vsel %vm767_vm10, %v759_v26, %v775_v55  ;;  %v1718_v40 = vsel %vm768_vm11, %v760_v29, %v776_v39  ;;  %v779_v56 = vmul.f32 0.01, %v763_v5 }
 0x2ec   :  { %v799_v45 = vrot.slane %v1716_v42, 1  ;;  %v800_v47 = vrot.slane %v1718_v40, 1  ;;  %v1722_v48 = vsel %vm769_vm12, %v761_v8, %v777_v9  ;;  %v838_v53 = vrot.slane %v1716_v42, 2 }
 0x2ed   :  { %828 = vrot.lane.b32.xlu1 %v812_v41, %s1355_s2  ;;  %v802_v51 = vrot.slane %v1722_v48, 1  ;;  %v839_v54 = vrot.slane %v1718_v40, 2  ;;  %v1734_v57 = vsel %vm770_vm13, %v762_v37, %v778_v43  ;;  %v841_v14 = vrot.slane %v1722_v48, 2 }
 0x2ee   :  { %v801_v50 = vsel %vm424_vm2, %v799_v45, %v800_v47  ;;  %v1746_v49 = vsel %vm771_vm14, %v763_v5, %v779_v56  ;;  %v804_v61 = vrot.slane %v1734_v57, 1  ;;  %v780_v63 = vmul.f32 0.01, %v764_v58 }
 0x2ef   :  { %814 = vrot.lane.b32.xlu0 %v801_v50, %s1355_s2  ;;  %v803_v16 = vsel %vm424_vm2, %v800_v47, %v802_v51  ;;  %v840_v60 = vsel %vm464_vm3, %v838_v53, %v839_v54  ;;  %v842_v1 = vsel %vm464_vm3, %v839_v54, %v841_v14  ;;  %v806_v2 = vrot.slane %v1746_v49, 1 }
 0x2f0   :  { %vm772_vm15 = vcmp.gt.f32.partialorder %v764_v58, 0.0  ;;  %v781_v4 = vmul.f32 0.01, %v765_v59  ;;  %v805_v6 = vsel %vm424_vm2, %v802_v51, %v804_v61  ;;  %v843_v10 = vrot.slane %v1734_v57, 2 }
 0x2f1   :  { %816 = vrot.lane.b32.xlu1 %v803_v16, %s1355_s2  ;;  %vm773_vm0 = vcmp.gt.f32.partialorder %v765_v59, 0.0  ;;  %v788_v11 = vsel %vm772_vm15, %v764_v58, %v780_v63  ;;  %v807_v31 = vsel %vm424_vm2, %v804_v61, %v806_v2  ;;  %v845_v12 = vrot.slane %v1746_v49, 2 }
 0x2f2   :  { %v789_v15 = vsel %vm773_vm0, %v765_v59, %v781_v4  ;;  %v844_v24 = vsel %vm464_vm3, %v841_v14, %v843_v10  ;;  %v808_v18 = vrot.slane %v788_v11, 1  ;;  %v847_v29 = vrot.slane %v788_v11, 2 }
 0x2f3   :  { %853 = vrot.lane.b32.xlu0 %v840_v60, %s1356_s27  ;;  %v846_v20 = vsel %vm464_vm3, %v843_v10, %v845_v12  ;;  %v810_v21 = vrot.slane %v789_v15, 1  ;;  %v849_v8 = vrot.slane %v789_v15, 2  ;;  %v851_v55 = vrot.slane %v1713_v33, 2 }
 0x2f4   :  { %v809_v26 = vsel %vm424_vm2, %v806_v2, %v808_v18  ;;  %v848_v37 = vsel %vm464_vm3, %v845_v12, %v847_v29  ;;  %v1212_v12 = vld [vmem:[%s1934_s4 + $0x2] ss:$0 sm:$0xff] }
 0x2f5   :  { %855 = vrot.lane.b32.xlu1 %v842_v1, %s1356_s27  ;;  %v811_v35 = vsel %vm424_vm2, %v808_v18, %v810_v21  ;;  %v850_v46 = vsel %vm464_vm3, %v847_v29, %v849_v8  ;;  %v813_v5 = vsel %vm424_vm2, %v810_v21, %v812_v41  ;;  %v852_v39 = vsel %vm464_vm3, %v849_v8, %v851_v55 }
 0x2f6   :  { %vm161_vm2 = vcmp.lt.s32.totalorder %v63_v3, 28  ;;  %vm165_vm3 = vcmp.lt.s32.totalorder %v91_v30, 28 }
 0x2f7   :  { %818 = vrot.lane.b32.xlu0 %v805_v6, %s1355_s2  ;;  %v1192_v21 = vsel %vm161_vm2, 1.0, %v1357_v7 }
 0x2f9   :  { %820 = vrot.lane.b32.xlu1 %v807_v31, %s1355_s2 }
 0x2fb   :  { %857 = vrot.lane.b32.xlu0 %v844_v24, %s1356_s27 }
 0x2fd   :  { %859 = vrot.lane.b32.xlu1 %v846_v20, %s1356_s27 }
 0x2ff   :  { %822 = vrot.lane.b32.xlu0 %v809_v26, %s1355_s2 }
 0x301   :  { %824 = vrot.lane.b32.xlu1 %v811_v35, %s1355_s2 }
 0x303   :  { %861 = vrot.lane.b32.xlu0 %v848_v37, %s1356_s27 }
 0x305   :  { %863 = vrot.lane.b32.xlu1 %v850_v46, %s1356_s27 }
 0x307   :  { %826 = vrot.lane.b32.xlu0 %v813_v5, %s1355_s2 }
 0x309   :  { %867 = vrot.lane.b32.xlu1 %v851_v55, %s1356_s27 }
 0x30b   :  { %865 = vrot.lane.b32.xlu0 %v852_v39, %s1356_s27 }
 0x35f   :  { %v829_v9 = vpop.permute.xlu1 %828 }
 0x361   :  { %v815_v43 = vpop.permute.xlu0 %814 }
 0x362   :  { %v877_v47 = vsel %vm325_vm1, %v1716_v42, %v815_v43 }
 0x363   :  { %v817_v45 = vpop.permute.xlu1 %816 }
 0x364   :  { %v878_v41 = vsel %vm325_vm1, %v1718_v40, %v817_v45 }
 0x365   :  { %v854_v51 = vpop.permute.xlu0 %853 }
 0x366   :  { %v885_v52 = vsel %vm512_vm4, %v877_v47, %v854_v51  ;;  %v1193_v51 = vsel %vm165_vm3, 1.0, %v1357_v7 }
 0x367   :  { %1308 = vmatprep.mubr.msk.f32.mxu0 %vm531_vm5, %v885_v52  ;;  %v856_v50 = vpop.permute.xlu1 %855 }
 0x368   :  { %v886_v53 = vsel %vm512_vm4, %v878_v41, %v856_v50 }
 0x369   :  { %v819_v54 = vpop.permute.xlu0 %818  ;;  %1309 = vmatmul.mubr.msk.f32.vlgmr.msra.gmra.mrb[6].mxu0 %vm531_vm5, %v886_v53 }
 0x36a   :  { %v879_v44 = vsel %vm325_vm1, %v1722_v48, %v819_v54 }
 0x36b   :  { %v821_v56 = vpop.permute.xlu1 %820 }
 0x36c   :  { %v880_v38 = vsel %vm325_vm1, %v1734_v57, %v821_v56 }
 0x36d   :  { %v858_v58 = vpop.permute.xlu0 %857 }
 0x36e   :  { %v887_v42 = vsel %vm512_vm4, %v879_v44, %v858_v58 }
 0x36f   :  { %1311 = vmatprep.mubr.msk.f32.mxu0 %vm531_vm5, %v887_v42  ;;  %v860_v40 = vpop.permute.xlu1 %859 }
 0x370   :  { %v888_v34 = vsel %vm512_vm4, %v880_v38, %v860_v40 }
 0x371   :  { %v823_v16 = vpop.permute.xlu0 %822  ;;  %1312 = vmatmul.mubr.msk.f32.gmra.mrb[8].mxu0 %vm531_vm5, %v888_v34 }
 0x372   :  { %v881_v59 = vsel %vm325_vm1, %v1746_v49, %v823_v16  ;;  %v884_v49 = vsel %vm325_vm1, %v1713_v33, %v829_v9 }
 0x373   :  { %v825_v14 = vpop.permute.xlu1 %824 }
 0x374   :  { %v882_v61 = vsel %vm325_vm1, %v788_v11, %v825_v14 }
 0x375   :  { %v862_v60 = vpop.permute.xlu0 %861 }
 0x376   :  { %v889_v48 = vsel %vm512_vm4, %v881_v59, %v862_v60 }
 0x377   :  { %1314 = vmatprep.mubr.msk.f32.mxu0 %vm531_vm5, %v889_v48  ;;  %v864_v57 = vpop.permute.xlu1 %863 }
 0x378   :  { %v890_v62 = vsel %vm512_vm4, %v882_v61, %v864_v57 }
 0x379   :  { %v827_v63 = vpop.permute.xlu0 %826  ;;  %1315 = vmatmul.mubr.msk.f32.gmra.mrb[10].mxu0 %vm531_vm5, %v890_v62 }
 0x37a   :  { %v883_v2 = vsel %vm325_vm1, %v789_v15, %v827_v63 }
 0x37b   :  { %v868_v1 = vpop.permute.xlu1 %867 }
 0x37c   :  { %v892_v10 = vsel %vm512_vm4, %v884_v49, %v868_v1 }
 0x37d   :  { %v866_v4 = vpop.permute.xlu0 %865 }
 0x37e   :  { %v891_v6 = vsel %vm512_vm4, %v883_v2, %v866_v4  ;;  %vm1053_vm4 = vcmask 125952  }
 0x37f   :  { %1317 = vmatprep.mubr.msk.f32.mxu0 %vm531_vm5, %v891_v6 }
 0x380   :  { %1318 = vmatmul.mubr.msk.f32.gmra.mrb[12].mxu0 %vm531_vm5, %v892_v10 }
 0x43c   :  { %v1310_v11 = vpop.f32.mrb[6].mxu0 }
 0x43d   :  { %v993_v31 = vpop.f32.mrb[7].mxu0  ;;  %v1813_v24 = vadd.f32 %v1310_v11, %v1212_v12 }
 0x43e   :  { %v1815_v15 = vadd.f32 %v1212_v12, %v993_v31 }
 0x43f   :  { %v1041_v29 = vsel %vm325_vm1, %v1813_v24, 0.0 }
 0x440   :  { %v1040_v35 = vsel %vm325_vm1, %v1815_v15, 0.0 }
 0x441   :  { %v1042_v3 = vadd.f32 %v1041_v29, %v1040_v35 }
 0x444   :  { %v1313_v33 = vpop.f32.mrb[8].mxu0 }
 0x445   :  { %v1819_v18 = vadd.f32 %v1313_v33, %v1212_v12  ;;  %v1003_v20 = vpop.f32.mrb[9].mxu0 }
 0x446   :  { %v1822_v26 = vadd.f32 %v1212_v12, %v1003_v20 }
 0x447   :  { %v1035_v8 = vmul.f32 %v1192_v21, %v1819_v18 }
 0x448   :  { %v1043_v0 = vsel %vm325_vm1, %v1822_v26, 0.0 }
 0x449   :  { %v1044_v37 = vadd.f32 %v1043_v0, %v1042_v3  ;;  %v1045_v5 = vsel %vm325_vm1, %v1035_v8, 0.0 }
 0x44b   :  { %v1046_v9 = vadd.f32 %v1045_v5, %v1044_v37 }
 0x44c   :  { %v1316_v46 = vpop.f32.mrb[10].mxu0 }
 0x44d   :  { %v1013_v55 = vpop.f32.mrb[11].mxu0  ;;  %v1838_v45 = vadd.f32 %v1316_v46, %v1212_v12 }
 0x44e   :  { %v1832_v39 = vadd.f32 %v1212_v12, %v1013_v55 }
 0x44f   :  { %v1049_v53 = vsel %vm325_vm1, %v1838_v45, 0.0 }
 0x450   :  { %v1047_v43 = vsel %vm325_vm1, %v1832_v39, 0.0 }
 0x451   :  { %v1048_v47 = vadd.f32 %v1047_v43, %v1046_v9 }
 0x453   :  { %v1319_v52 = vpop.f32.mrb[12].mxu0  ;;  %v1050_v44 = vadd.f32 %v1049_v53, %v1048_v47 }
 0x454   :  { %v1841_v41 = vadd.f32 %v1319_v52, %v1212_v12  ;;  %v1023_v50 = vpop.f32.mrb[13].mxu0 }
 0x455   :  { %v1845_v54 = vadd.f32 %v1212_v12, %v1023_v50 }
 0x456   :  { %v1039_v56 = vmul.f32 %v1193_v51, %v1841_v41 }
 0x457   :  { %v1051_v19 = vsel %vm325_vm1, %v1845_v54, 0.0 }
 0x458   :  { %v1054_v30 = vsel %vm1053_vm4, %v1039_v56, 0.0  ;;  %v1052_v58 = vadd.f32 %v1051_v19, %v1050_v44 }
 0x45a   :  { %v1055_v7 = vadd.f32 %v1054_v30, %v1052_v58 }
 0x45c   :  { %v1056_v42 = vrot.slane %v1055_v7, 4 }
 0x45e   :  { %v1057_v38 = vadd.f32 %v1056_v42, %v1055_v7 }
 0x460   :  { %v1058_v40 = vrot.slane %v1057_v38, 2 }
 0x462   :  { %v1059_v34 = vadd.f32 %v1058_v40, %v1057_v38  ;;  %v27_v38 = vld [vmem:[%s1934_s4 + $0x7] sm:$0x1] }
 0x464   :  { %v1060_v16 = vrot.slane %v1059_v34, 1 }
 0x466   :  { %v1061_v14 = vadd.f32 %v1060_v16, %v1059_v34  ;;  %v28_v16 = vld [vmem:[%s1934_s4 + $0x8] sm:$0x1] }
 0x468   :  { %v1062_v59 = vmul.f32 0.017857144, %v1061_v14 }
 0x46a   :  { %v1063_v60 = vsub.f32 %v1815_v15, %v1062_v59  ;;  %v1064_v48 = vsub.f32 %v1813_v24, %v1062_v59  ;;  %v1065_v61 = vsub.f32 %v1822_v26, %v1062_v59  ;;  %v1066_v57 = vsub.f32 %v1819_v18, %v1062_v59 }
 0x46b   :  { %v1067_v62 = vsub.f32 %v1832_v39, %v1062_v59  ;;  %v1068_v49 = vsub.f32 %v1838_v45, %v1062_v59  ;;  %v1070_v6 = vsub.f32 %v1841_v41, %v1062_v59  ;;  %v1069_v33 = vsub.f32 %v1845_v54, %v1062_v59 }
 0x46c   :  { %v1074_v63 = vmul.f32 %v1192_v21, %v1066_v57  ;;  %v1079_v1 = vmul.f32 %v1063_v60, %v1063_v60  ;;  %v1080_v2 = vmul.f32 %v1064_v48, %v1064_v48  ;;  %v1081_v4 = vmul.f32 %v1065_v61, %v1065_v61 }
 0x46d   :  { %v1083_v20 = vmul.f32 %v1067_v62, %v1067_v62  ;;  %v1078_v21 = vmul.f32 %v1193_v51, %v1070_v6  ;;  %v1084_v8 = vmul.f32 %v1068_v49, %v1068_v49  ;;  %v1085_v37 = vmul.f32 %v1069_v33, %v1069_v33 }
 0x46e   :  { %v1082_v10 = vmul.f32 %v1074_v63, %v1074_v63  ;;  %v1087_v11 = vsel %vm325_vm1, %v1079_v1, 0.0  ;;  %v1088_v31 = vsel %vm325_vm1, %v1080_v2, 0.0  ;;  %v1090_v29 = vsel %vm325_vm1, %v1081_v4, 0.0 }
 0x46f   :  { %v1089_v12 = vadd.f32 %v1088_v31, %v1087_v11  ;;  %v1094_v46 = vsel %vm325_vm1, %v1083_v20, 0.0  ;;  %v1086_v55 = vmul.f32 %v1078_v21, %v1078_v21  ;;  %v1096_v9 = vsel %vm325_vm1, %v1084_v8, 0.0 }
 0x470   :  { %v1092_v0 = vsel %vm325_vm1, %v1082_v10, 0.0  ;;  %v1098_v47 = vsel %vm325_vm1, %v1085_v37, 0.0 }
 0x471   :  { %v1091_v35 = vadd.f32 %v1090_v29, %v1089_v12  ;;  %v1100_v50 = vsel %vm1053_vm4, %v1086_v55, 0.0 }
 0x473   :  { %v1093_v3 = vadd.f32 %v1092_v0, %v1091_v35 }
 0x475   :  { %v1095_v5 = vadd.f32 %v1094_v46, %v1093_v3 }
 0x477   :  { %v1097_v43 = vadd.f32 %v1096_v9, %v1095_v5 }
 0x479   :  { %v1099_v52 = vadd.f32 %v1098_v47, %v1097_v43 }
 0x47b   :  { %v1101_v53 = vadd.f32 %v1100_v50, %v1099_v52 }
 0x47d   :  { %v1102_v56 = vrot.slane %v1101_v53, 4 }
 0x47f   :  { %v1103_v51 = vadd.f32 %v1102_v56, %v1101_v53 }
 0x481   :  { %v1104_v44 = vrot.slane %v1103_v51, 2 }
 0x483   :  { %v1105_v19 = vadd.f32 %v1104_v44, %v1103_v51 }
 0x485   :  { %v1106_v30 = vrot.slane %v1105_v19, 1 }
 0x487   :  { %v1107_v58 = vadd.f32 %v1106_v30, %v1105_v19 }
 0x489   :  { %v1108_v7 = vmul.f32 0.017857144, %v1107_v58 }
 0x48b   :  { %v1109_v42 = vadd.f32 1e-05, %v1108_v7 }
 0x48d   :  { %1353 = vrsqrt.f32 %v1109_v42 }
 0x497   :  { %v1354_v40 = vpop.eup %1353 }
 0x498   :  { %v1111_v34 = vmul.f32 %v1354_v40, %v27_v38 }
 0x49a   :  { %v1112_v14 = vmul.f32 %v1111_v34, %v1062_v59  ;;  %v1117_v60 = vrot.slane %v1111_v34, %v1486_v36 }
 0x49c   :  { %v1113_v48 = vsub.f32 %v28_v16, %v1112_v14  ;;  %v1118_v61 = vmul.f32 %v1117_v60, %v1815_v15  ;;  %v1119_v57 = vmul.f32 %v1117_v60, %v1813_v24  ;;  %v1120_v62 = vmul.f32 %v1117_v60, %v1822_v26 }
 0x49d   :  { %v1121_v63 = vmul.f32 %v1117_v60, %v1819_v18  ;;  %v1122_v2 = vmul.f32 %v1117_v60, %v1832_v39  ;;  %v1123_v4 = vmul.f32 %v1117_v60, %v1838_v45  ;;  %v1124_v49 = vmul.f32 %v1117_v60, %v1845_v54 }
 0x49e   :  { %v1129_v1 = vrot.slane %v1113_v48, %v1486_v36  ;;  %v1125_v59 = vmul.f32 %v1117_v60, %v1841_v41 }
 0x4a0   :  { %v1130_v6 = vadd.f32 %v1129_v1, %v1118_v61  ;;  %v1131_v10 = vadd.f32 %v1129_v1, %v1119_v57  ;;  %v1132_v11 = vadd.f32 %v1129_v1, %v1120_v62  ;;  %v1133_v15 = vadd.f32 %v1129_v1, %v1121_v63 }
 0x4a1   :  { %v1134_v31 = vadd.f32 %v1129_v1, %v1122_v2  ;;  %v1135_v24 = vadd.f32 %v1129_v1, %v1123_v4  ;;  %v1136_v12 = vadd.f32 %v1129_v1, %v1124_v49  ;;  %v1137_v26 = vadd.f32 %v1129_v1, %v1125_v59 }
 0x4a2   :  { %v1146_v18 = vadd.f32 %v1130_v6, %v1531_v23  ;;  %v1147_v36 = vadd.f32 %v1131_v10, %v1543_v32  ;;  %v1148_v39 = vadd.f32 %v1132_v11, %v1556_v13  ;;  %v1149_v45 = vadd.f32 %v1133_v15, %v1561_v17 }
 0x4a3   :  { %v1150_v54 = vadd.f32 %v1134_v31, %v1570_v22  ;;  %v1151_v41 = vadd.f32 %v1135_v24, %v1575_v25  ;;  %v1152_v33 = vadd.f32 %v1136_v12, %v1588_v28  ;;  %v1153_v20 = vadd.f32 %v1137_v26, %v1581_v27 }
 0x4a4   :  { %vm1154_vm5 = vcmp.gt.f32.partialorder %v1146_v18, 0.0  ;;  %vm1155_vm6 = vcmp.gt.f32.partialorder %v1147_v36, 0.0  ;;  %vm1156_vm7 = vcmp.gt.f32.partialorder %v1148_v39, 0.0  ;;  %vm1157_vm8 = vcmp.gt.f32.partialorder %v1149_v45, 0.0 }
 0x4a5   :  { %vm1158_vm9 = vcmp.gt.f32.partialorder %v1150_v54, 0.0  ;;  %vm1159_vm10 = vcmp.gt.f32.partialorder %v1151_v41, 0.0  ;;  %vm1160_vm11 = vcmp.gt.f32.partialorder %v1152_v33, 0.0  ;;  %vm1161_vm12 = vcmp.gt.f32.partialorder %v1153_v20, 0.0 }
 0x4a6   :  { %v1162_v23 = vmul.f32 0.01, %v1146_v18  ;;  %v1163_v32 = vmul.f32 0.01, %v1147_v36  ;;  %v1164_v13 = vmul.f32 0.01, %v1148_v39 }
 0x4a7   :  { %v1165_v17 = vmul.f32 0.01, %v1149_v45  ;;  %v1166_v29 = vmul.f32 0.01, %v1150_v54  ;;  %v1167_v22 = vmul.f32 0.01, %v1151_v41 }
 0x4a8   :  { %v1168_v35 = vmul.f32 0.01, %v1152_v33  ;;  %v1169_v25 = vmul.f32 0.01, %v1153_v20  ;;  %v1170_v28 = vsel %vm1154_vm5, %v1146_v18, %v1162_v23  ;;  %v1171_v27 = vsel %vm1155_vm6, %v1147_v36, %v1163_v32 }
 0x4a9   :  { %v1172_v21 = vsel %vm1156_vm7, %v1148_v39, %v1164_v13  ;;  %v1173_v8 = vsel %vm1157_vm8, %v1149_v45, %v1165_v17  ;;  %v1174_v0 = vsel %vm1158_vm9, %v1150_v54, %v1166_v29  ;;  %v1175_v3 = vsel %vm1159_vm10, %v1151_v41, %v1167_v22  ;;  %1178 = vst.msk [vmem:[%s1936_s5] sm:$0xff] %vm325_vm1, %v1170_v28 }
 0x4aa   :  { %1179 = vst.msk [vmem:[%s1936_s5 + $0x8] sm:$0xff] %vm325_vm1, %v1171_v27  ;;  %v1176_v37 = vsel %vm1160_vm11, %v1152_v33, %v1168_v35  ;;  %v1177_v46 = vsel %vm1161_vm12, %v1153_v20, %v1169_v25  ;;  %1180 = vst.msk [vmem:[%s1936_s5 + $0x10] sm:$0xff] %vm325_vm1, %v1172_v21 }
 0x4ab   :  { %1181 = vst.msk [vmem:[%s1936_s5 + $0x18] sm:$0xff] %vm325_vm1, %v1173_v8  ;;  %1182 = vst.msk [vmem:[%s1936_s5 + $0x20] sm:$0xff] %vm325_vm1, %v1174_v0 }
 0x4ac   :  { %1183 = vst.msk [vmem:[%s1936_s5 + $0x28] sm:$0xff] %vm325_vm1, %v1175_v3  ;;  %1184 = vst.msk [vmem:[%s1936_s5 + $0x30] sm:$0xff] %vm325_vm1, %v1176_v37 }
 0x4ad   :  { %1185 = vst.msk [vmem:[%s1936_s5 + $0x38] sm:$0xf] %vm1053_vm4, %v1177_v46 }

</bundles_post_ra>
